<compile_context>
chip_gen: v7x
topology: tpu7x:2x2x1
jax: 0.10.0
libtpu: 0.0.40
codegen_flags: <defaults>
</compile_context>

<pallas_src>
import functools

import jax
import jax.numpy as jnp
from jax import lax
from jax.experimental import pallas as pl
from jax.experimental.pallas import tpu as pltpu


_VMEM_LIMIT_BYTES = 32 * 1024 * 1024      # safe on v5e/v6e (128 MiB) and v7x (64 MiB)
_LOGITS_BLOCK_BUDGET = 4 * 1024 * 1024    # bytes per pipeline buffer (x2 double-buffered)
_MAX_TILE_M = 2048
_NUM_PARTITIONS = 2                        # v7x has 2 TensorCores; no-op on v5e/v6e


def _ce_kernel(logits_ref, labels_ref, part_ref, *, total_n, tile_m, blocks_per_part):
    """Per-row cross-entropy, accumulated into a (tile_m, 1) partial-sum block."""
    p = pl.program_id(0)   # partition (parallel across TensorCores on v7x)
    i = pl.program_id(1)   # row-block within the partition (reduction axis)

    @pl.when(i == 0)
    def _():
        part_ref[...] = jnp.zeros_like(part_ref)

    # Upcast inside the kernel: bf16 logits cross HBM at half the bytes.
    logits = logits_ref[...].astype(jnp.float32)               # (TM, C)
    labels = labels_ref[...]                                    # (TM, 1) int32

    # Numerically stable cross-entropy, fully in shifted space:
    #   ce = logsumexp(x) - x[label]
    #      = log(sum(exp(x - max))) - (x[label] - max)
    row_max = jnp.max(logits, axis=-1, keepdims=True)           # (TM, 1)
    shifted = logits - row_max                                   # (TM, C)
    lse_shifted = jnp.log(jnp.sum(jnp.exp(shifted), axis=-1, keepdims=True))

    # shifted[label] via one-hot select against a class-axis iota (no gather on TPU).
    class_iota = lax.broadcasted_iota(jnp.int32, shifted.shape, 1)
    target_shifted = jnp.sum(
        jnp.where(class_iota == labels, shifted, 0.0), axis=-1, keepdims=True)

    ce = lse_shifted - target_shifted                             # (TM, 1)

    # Mask rows beyond N (partial last tile + phantom steps of the clamped
    # index_map).  Use jnp.where, not multiply: garbage tail rows may hold
    # NaN/Inf and NaN * 0 is NaN.
    row0 = (p * blocks_per_part + i) * tile_m
    row_iota = lax.broadcasted_iota(jnp.int32, ce.shape, 0) + row0
    part_ref[...] += jnp.where(row_iota < total_n, ce, 0.0)


def _cross_entropy_mean(logits, labels, *, tile_m=None, num_partitions=_NUM_PARTITIONS):
    """Mean cross-entropy over rows of (N, C) logits with (N,) int labels."""
    n, c = logits.shape
    itemsize = jnp.dtype(logits.dtype).itemsize
    gran = 8 if itemsize >= 4 else 16   # min sublane granularity (16 for bf16)

    # Only truly tiny inputs get padded; large slabs are never copied in HBM.
    n_rows = n
    if n_rows < gran:
        pad = gran - n_rows
        logits = jnp.pad(logits, ((0, pad), (0, 0)))
        labels = jnp.pad(labels, ((0, pad),))
        n_rows = gran

    # Tile sizing: largest row tile whose logits block fits the VMEM budget,
    # capped so the block never exceeds the array (partial last tile is fine).
    if tile_m is None:
        tile_m = min(_MAX_TILE_M, _LOGITS_BLOCK_BUDGET // max(1, c * itemsize))
    tile_m = max(gran, (tile_m // gran) * gran)
    tile_m = min(tile_m, (n_rows // gran) * gran)

    labels2d = labels.astype(jnp.int32).reshape(n_rows, 1)

    nblocks = pl.cdiv(n_rows, tile_m)
    parts = max(1, min(num_partitions, nblocks))
    blocks_per_part = pl.cdiv(nblocks, parts)

    def row_block_map(p, i):
        # Clamp phantom trailing steps onto the last real block (keeps the DMA
        # in-bounds); their contribution is masked out inside the kernel.
        return (jnp.minimum(p * blocks_per_part + i, nblocks - 1), 0)

    kernel = functools.partial(
        _ce_kernel, total_n=n, tile_m=tile_m, blocks_per_part=blocks_per_part)

    partials = pl.pallas_call(
        kernel,
        out_shape=jax.ShapeDtypeStruct((parts, tile_m, 1), jnp.float32),
        grid_spec=pltpu.PrefetchScalarGridSpec(
            num_scalar_prefetch=0,
            grid=(parts, blocks_per_part),
            in_specs=[
                pl.BlockSpec((tile_m, c), row_block_map),
                pl.BlockSpec((tile_m, 1), row_block_map),
            ],
            out_specs=pl.BlockSpec((None, tile_m, 1), lambda p, i: (p, 0, 0)),
        ),
        compiler_params=pltpu.CompilerParams(
            dimension_semantics=("parallel", "arbitrary"),
            vmem_limit_bytes=_VMEM_LIMIT_BYTES,
        ),
    )(logits, labels2d)

    # Tiny (parts * tile_m) reduction + mean happen in plain XLA.
    return jnp.sum(partials) / jnp.float32(n)


def multiple_loss(y_pred, y_true, **kwargs):
    """JAX/Pallas equivalent of MultipleLoss.forward."""
    assert (y_pred.ndim == 3 and y_true.ndim == 2) or (
        y_pred.ndim == 2 and y_true.ndim == 1
    )
    if y_pred.ndim == 3:
        b, a, c = y_pred.shape
        # sum_k mean_b CE(y_pred[:,k,:], y_true[:,k]) / A
        #   == mean over all (b, k) rows, streamed as one (B*A, C) slab.
        return _cross_entropy_mean(
            y_pred.reshape(b * a, c), y_true.reshape(b * a), **kwargs)
    return _cross_entropy_mean(y_pred, y_true, **kwargs)


def _reference_ce(y_pred, y_true):
    # Pure-JAX reference for sanity check.
    if y_pred.ndim == 3:
        b, a, c = y_pred.shape
        y_pred = y_pred.reshape(b * a, c)
        y_true = y_true.reshape(b * a)
    logp = jax.nn.log_softmax(y_pred.astype(jnp.float32), axis=-1)
    return -jnp.mean(
        jnp.take_along_axis(logp, y_true[:, None].astype(jnp.int32), axis=-1))


if __name__ == "__main__":
    key = jax.random.PRNGKey(0)
    k1, k2, k3, k4, k5, k6 = jax.random.split(key, 6)

    # 3D case: batch=2, attributes=8, classes=16 (single tile).
    B, A, C = 2, 8, 16
    y_pred3 = jax.random.normal(k1, (B, A, C), dtype=jnp.float32)
    y_true2 = jax.random.randint(k2, (B, A), 0, C, dtype=jnp.int32)
    loss3 = multiple_loss(y_pred3, y_true2)
    jax.block_until_ready(loss3)
    ref3 = _reference_ce(y_pred3, y_true2)
    assert jnp.allclose(loss3, ref3, atol=1e-5, rtol=1e-5), (loss3, ref3)

    # 2D case: N=10 (partial last tile + both partitions active), classes=16.
    N = 10
    y_pred2 = jax.random.normal(k3, (N, C), dtype=jnp.float32)
    y_true1 = jax.random.randint(k4, (N,), 0, C, dtype=jnp.int32)
    loss2 = multiple_loss(y_pred2, y_true1)
    jax.block_until_ready(loss2)
    ref2 = _reference_ce(y_pred2, y_true1)
    assert jnp.allclose(loss2, ref2, atol=1e-5, rtol=1e-5), (loss2, ref2)

    # bf16 logits: streamed at half the HBM bytes, upcast in-kernel.
    y_pred3_bf16 = y_pred3.astype(jnp.bfloat16)
    loss3b = multiple_loss(y_pred3_bf16, y_true2)
    jax.block_until_ready(loss3b)
    ref3b = _reference_ce(y_pred3_bf16, y_true2)
    assert jnp.allclose(loss3b, ref3b, atol=1e-4, rtol=1e-4), (loss3b, ref3b)

    # Multi-block accumulation + phantom-step clamping (forced tiny tile).
    N2 = 40
    y_pred_mb = jax.random.normal(k5, (N2, C), dtype=jnp.float32)
    y_true_mb = jax.random.randint(k6, (N2,), 0, C, dtype=jnp.int32)
    loss_mb = multiple_loss(y_pred_mb, y_true_mb, tile_m=8)
    jax.block_until_ready(loss_mb)
    ref_mb = _reference_ce(y_pred_mb, y_true_mb)
    assert jnp.allclose(loss_mb, ref_mb, atol=1e-5, rtol=1e-5), (loss_mb, ref_mb)

    print("KERNEL_OK")
</pallas_src>

<mosaic_0001>
module attributes {stable_mosaic.version = 11 : i64} {
  func.func @_ce_kernel(%arg0: i32, %arg1: i32, %arg2: memref<16x16xf32, #tpu.memory_space<vmem>>, %arg3: memref<16x1xi32, #tpu.memory_space<vmem>>, %arg4: memref<1x16x1xf32, #tpu.memory_space<vmem>>) attributes {dimension_semantics = [#tpu.dimension_semantics<parallel>, #tpu.dimension_semantics<arbitrary>], iteration_bounds = array<i64: 1, 1>, scalar_prefetch = 0 : i64, scratch_operands = 0 : i64, tpu.core_type = #tpu.core_type<tc>, window_params = [{transform_indices = @transform_0, window_bounds = array<i64: 16, 16>}, {transform_indices = @transform_1, window_bounds = array<i64: 16, 1>}, {transform_indices = @transform_2, window_bounds = array<i64: 1, 16, 1>}]} {
    %c0_i32 = arith.constant 0 : i32
    %0 = arith.cmpi eq, %arg1, %c0_i32 : i32
    %1 = arith.extui %0 : i1 to i32
    %c0_i32_0 = arith.constant 0 : i32
    %2 = arith.cmpi ne, %1, %c0_i32_0 : i32
    scf.if %2 {
      %cst_15 = arith.constant 0.000000e+00 : f32
      %37 = vector.broadcast %cst_15 : f32 to vector<16x1xf32>
      %c0_16 = arith.constant 0 : index
      %c0_17 = arith.constant 0 : index
      %c0_18 = arith.constant 0 : index
      %38 = vector.load %arg4[%c0_16, %c0_17, %c0_18] : memref<1x16x1xf32, #tpu.memory_space<vmem>>, vector<1x16x1xf32>
      %39 = vector.shape_cast %38 : vector<1x16x1xf32> to vector<16x1xf32>
      %40 = vector.shape_cast %37 : vector<16x1xf32> to vector<1x16x1xf32>
      tpu.vector_store %arg4[%c0_16, %c0_17, %c0_18], %40 {strides = array<i32>} : memref<1x16x1xf32, #tpu.memory_space<vmem>>, vector<1x16x1xf32>,
    } else {
    }
    %c0 = arith.constant 0 : index
    %c0_1 = arith.constant 0 : index
    %3 = vector.load %arg2[%c0, %c0_1] : memref<16x16xf32, #tpu.memory_space<vmem>>, vector<16x16xf32>
    %c0_2 = arith.constant 0 : index
    %c0_3 = arith.constant 0 : index
    %4 = vector.load %arg3[%c0_2, %c0_3] : memref<16x1xi32, #tpu.memory_space<vmem>>, vector<16x1xi32>
    %cst = arith.constant dense<0xFF800000> : vector<16xf32>
    %5 = vector.multi_reduction <maximumf>, %3, %cst [1] : vector<16x16xf32> to vector<16xf32>
    %6 = vector.shape_cast %5 : vector<16xf32> to vector<16x1xf32>
    %7 = vector.broadcast %6 : vector<16x1xf32> to vector<16x16xf32>
    %8 = arith.subf %3, %7 : vector<16x16xf32>
    %9 = math.exp %8 : vector<16x16xf32>
    %cst_4 = arith.constant dense<0.000000e+00> : vector<16xf32>
    %10 = vector.multi_reduction <add>, %9, %cst_4 [1] : vector<16x16xf32> to vector<16xf32>
    %11 = vector.shape_cast %10 : vector<16xf32> to vector<16x1xf32>
    %12 = math.log %11 : vector<16x1xf32>
    %13 = tpu.iota {dimensions = array<i32: 1>} : vector<16x16xi32>
    %14 = vector.broadcast %4 : vector<16x1xi32> to vector<16x16xi32>
    %15 = arith.cmpi eq, %13, %14 : vector<16x16xi32>
    %cst_5 = arith.constant 0.000000e+00 : f32
    %16 = vector.broadcast %cst_5 : f32 to vector<16x16xf32>
    %17 = arith.select %15, %8, %16 : vector<16x16xi1>, vector<16x16xf32>
    %cst_6 = arith.constant dense<0.000000e+00> : vector<16xf32>
    %18 = vector.multi_reduction <add>, %17, %cst_6 [1] : vector<16x16xf32> to vector<16xf32>
    %19 = vector.shape_cast %18 : vector<16xf32> to vector<16x1xf32>
    %20 = arith.subf %12, %19 : vector<16x1xf32>
    %c1_i32 = arith.constant 1 : i32
    %21 = arith.muli %arg0, %c1_i32 : i32
    %22 = arith.addi %21, %arg1 : i32
    %c16_i32 = arith.constant 16 : i32
    %23 = arith.muli %22, %c16_i32 : i32
    %24 = tpu.iota {dimensions = array<i32: 0>} : vector<16x1xi32>
    %25 = vector.broadcast %23 : i32 to vector<16x1xi32>
    %26 = arith.addi %24, %25 : vector<16x1xi32>
    %c0_7 = arith.constant 0 : index
    %c0_8 = arith.constant 0 : index
    %c0_9 = arith.constant 0 : index
    %27 = vector.load %arg4[%c0_7, %c0_8, %c0_9] : memref<1x16x1xf32, #tpu.memory_space<vmem>>, vector<1x16x1xf32>
    %28 = vector.shape_cast %27 : vector<1x16x1xf32> to vector<16x1xf32>
    %c16_i32_10 = arith.constant 16 : i32
    %29 = vector.broadcast %c16_i32_10 : i32 to vector<16x1xi32>
    %30 = arith.cmpi slt, %26, %29 : vector<16x1xi32>
    %cst_11 = arith.constant 0.000000e+00 : f32
    %31 = vector.broadcast %cst_11 : f32 to vector<16x1xf32>
    %32 = arith.select %30, %20, %31 : vector<16x1xi1>, vector<16x1xf32>
    %33 = arith.addf %28, %32 : vector<16x1xf32>
    %c0_12 = arith.constant 0 : index
    %c0_13 = arith.constant 0 : index
    %c0_14 = arith.constant 0 : index
    %34 = vector.load %arg4[%c0_12, %c0_13, %c0_14] : memref<1x16x1xf32, #tpu.memory_space<vmem>>, vector<1x16x1xf32>
    %35 = vector.shape_cast %34 : vector<1x16x1xf32> to vector<16x1xf32>
    %36 = vector.shape_cast %33 : vector<16x1xf32> to vector<1x16x1xf32>
    tpu.vector_store %arg4[%c0_12, %c0_13, %c0_14], %36 {strides = array<i32>} : memref<1x16x1xf32, #tpu.memory_space<vmem>>, vector<1x16x1xf32>,
    return
  }
  func.func @transform_0(%arg0: i32, %arg1: i32) -> (i32, i32) {
    %c1_i32 = arith.constant 1 : i32
    %0 = arith.muli %arg0, %c1_i32 : i32
    %1 = arith.addi %0, %arg1 : i32
    %c0_i32 = arith.constant 0 : i32
    %2 = arith.minsi %1, %c0_i32 : i32
    %c0_i32_0 = arith.constant 0 : i32
    %c0_i32_1 = arith.constant 0 : i32
    return %2, %c0_i32_0 : i32, i32
  }
  func.func @transform_1(%arg0: i32, %arg1: i32) -> (i32, i32) {
    %c1_i32 = arith.constant 1 : i32
    %0 = arith.muli %arg0, %c1_i32 : i32
    %1 = arith.addi %0, %arg1 : i32
    %c0_i32 = arith.constant 0 : i32
    %2 = arith.minsi %1, %c0_i32 : i32
    %c0_i32_0 = arith.constant 0 : i32
    %c0_i32_1 = arith.constant 0 : i32
    return %2, %c0_i32_0 : i32, i32
  }
  func.func @transform_2(%arg0: i32, %arg1: i32) -> (i32, i32, i32) {
    %c0_i32 = arith.constant 0 : i32
    %c0_i32_0 = arith.constant 0 : i32
    %c0_i32_1 = arith.constant 0 : i32
    return %arg0, %c0_i32, %c0_i32_0 : i32, i32, i32
  }
}

</mosaic_0001>

<bundles_post_ra>
// kernel: tpu_custom_call.1
= control target key start
LH: loop header
LB: loop body
LE: loop exit
PB: predicated region body
PF: predicated region fallthrough
CT: control target
= control target key end

     0   :  { %vm86_vm0 = vcmask 130048   ;;  %v176_v2 = vmov 0   ;;  %v109_v12 = vlaneseq  ;;  %vm79_vm3 = vcmask 7168   ;;  %s233_s0 = inlined_call_operand.vmem [shape: f32[16,16], index: 0, kind: input, shape index: {}]   ;;  %s234_s1 = inlined_call_operand.vmem [shape: s32[16,1], index: 1, kind: input, shape index: {}]   ;;  %s235_s2 = inlined_call_operand.vmem [shape: f32[1,16,1], index: 2, kind: output, shape index: {}]  }
   0x1   :  { %v82_v0 = vld [vmem:[%s233_s0] sm:$0xff]  ;;  %v83_v1 = vld [vmem:[%s233_s0 + $0x8] sm:$0xff]  ;;  %166 = vset.pattern.permute.xlu1 %v176_v2  ;;  %167 = vset.pattern.permute.xlu0 %v176_v2  ;;  %v177_v25 = vmov 0.0  }
   0x2   :  { %v84_v3 = vld [vmem:[%s234_s1] sm:$0xff]  ;;  %v87_v4 = vsel %vm86_vm0, %v82_v0, -inf  ;;  %v85_v5 = vld [vmem:[%s234_s1 + $0x8] sm:$0xff]  ;;  %v90_v6 = vsel %vm86_vm0, %v83_v1, -inf  ;;  %v110_v15 = vand.u32 127, %v109_v12  ;;  %80 = vst.msk [vmem:[%s235_s2] sm:$0xff] %vm79_vm3, %v177_v25 }
   0x3   :  { %112 = vperm.xlu1 %166, %v84_v3   ;;  %88 = vmax.xlane.f32.xlu0 %v87_v4  ;;  %81 = vst.msk [vmem:[%s235_s2 + $0x8] sm:$0xff] %vm79_vm3, %v177_v25 }
   0x7   :  { %115 = vperm.xlu1 %166, %v85_v5   ;;  %91 = vmax.xlane.f32.xlu0 %v90_v6 }
   0x9   :  { %v137_v31 = vld [vmem:[%s235_s2] sm:$0xff] }
   0xa   :  { %v138_v36 = vld [vmem:[%s235_s2 + $0x8] sm:$0xff] }
  0x82   :  { %v113_v14 = vpop.permute.xlu1 %112 }
  0x83   :  { %vm117_vm1 = vcmp.eq.s32.totalorder %v110_v15, %v113_v14 }
  0x86   :  { %v116_v17 = vpop.permute.xlu1 %115 }
  0x87   :  { %vm118_vm2 = vcmp.eq.s32.totalorder %v110_v15, %v116_v17 }
  0x90   :  { %v89_v7 = vpop.xlane.xlu0 %88 }
  0x91   :  { %v93_v8 = vsub.f32 %v82_v0, %v89_v7 }
  0x93   :  { %v95_v9 = vmul.f32 1.442695, %v93_v8  ;;  %v119_v19 = vsel %vm117_vm1, %v93_v8, 0.0 }
  0x94   :  { %v92_v10 = vpop.xlane.xlu0 %91  ;;  %v121_v21 = vsel %vm86_vm0, %v119_v19, 0.0 }
  0x95   :  { %168 = vpow2.f32 %v95_v9  ;;  %v94_v11 = vsub.f32 %v83_v1, %v92_v10 }
  0x97   :  { %v97_v13 = vmul.f32 1.442695, %v94_v11  ;;  %v120_v23 = vsel %vm118_vm2, %v94_v11, 0.0 }
  0x98   :  { %v124_v24 = vsel %vm86_vm0, %v120_v23, 0.0 }
  0x99   :  { %170 = vpow2.f32 %v97_v13 }
  0x9f   :  { %v169_v16 = vpop.eup %168 }
  0xa0   :  { %v99_v18 = vsel %vm86_vm0, %v169_v16, 0.0 }
  0xa1   :  { %100 = vadd.xlane.f32.xlu0 %v99_v18 }
  0xa3   :  { %v171_v20 = vpop.eup %170 }
  0xa4   :  { %v102_v22 = vsel %vm86_vm0, %v171_v20, 0.0 }
  0xa5   :  { %122 = vadd.xlane.f32.xlu0 %v121_v21  ;;  %103 = vadd.xlane.f32.xlu1 %v102_v22 }
  0xa9   :  { %125 = vadd.xlane.f32.xlu0 %v124_v24 }
 0x12e   :  { %v101_v26 = vpop.xlane.xlu0 %100 }
 0x12f   :  { %172 = vlog2.f32 %v101_v26 }
 0x132   :  { %v104_v27 = vpop.xlane.xlu1 %103  ;;  %v123_v29 = vpop.xlane.xlu0 %122 }
 0x133   :  { %174 = vlog2.f32 %v104_v27 }
 0x136   :  { %v126_v37 = vpop.xlane.xlu0 %125 }
 0x139   :  { %v173_v28 = vpop.eup %172 }
 0x13a   :  { %v106_v30 = vmul.f32 0.6931472, %v173_v28 }
 0x13c   :  { %v127_v32 = vsub.f32 %v106_v30, %v123_v29 }
 0x13d   :  { %v175_v33 = vpop.eup %174 }
 0x13e   :  { %v143_v34 = vadd.f32 %v137_v31, %v127_v32  ;;  %v108_v35 = vmul.f32 0.6931472, %v175_v33 }
 0x140   :  { %146 = vst.msk [vmem:[%s235_s2] sm:$0xff] %vm79_vm3, %v143_v34  ;;  %v128_v38 = vsub.f32 %v108_v35, %v126_v37 }
 0x142   :  { %v144_v39 = vadd.f32 %v138_v36, %v128_v38 }
 0x144   :  { %147 = vst.msk [vmem:[%s235_s2 + $0x8] sm:$0xff] %vm79_vm3, %v144_v39 }

</bundles_post_ra>
